<compile_context>
chip_gen: v5e
topology: v5e:2x2
jax: 0.10.0
libtpu: 0.0.40
codegen_flags: <defaults>
</compile_context>

<pallas_src>
import functools

import jax
import jax.numpy as jnp
from jax.experimental import pallas as pl
from jax.experimental.pallas import tpu as pltpu


_MAX_T_BLOCK = 512   # timesteps resident in VMEM per grid step (multiple of 8)
_MAX_B_BLOCK = 128   # batch rows per parallel grid step (multiple of 8)


# ----------------------------------------------------------------------------
# Pallas kernels
# ----------------------------------------------------------------------------
def input_proj_kernel(x_ref, w_ref, b_ref, o_ref):
    """One row-chunk of G = X @ [W_ir|W_iz|W_in] + (b_ir+b_hr | b_iz+b_hz | b_in)."""
    o_ref[...] = (
        jnp.dot(x_ref[...], w_ref[...], preferred_element_type=jnp.float32)
        + b_ref[...]
    ).astype(o_ref.dtype)


def _gru_step(g_t, h, w_h, b_hn, hidden):
    """One GRU timestep.  g_t: (B,3H) precomputed input projections (biases folded),
    h: (B,H) previous hidden state.  Single packed (B,H)@(H,3H) matmul for h-part."""
    hw = jnp.dot(h, w_h, preferred_element_type=jnp.float32)        # (B, 3H)
    r = jax.nn.sigmoid(g_t[:, :hidden] + hw[:, :hidden])
    z = jax.nn.sigmoid(g_t[:, hidden:2 * hidden] + hw[:, hidden:2 * hidden])
    n = jnp.tanh(g_t[:, 2 * hidden:] + r * (hw[:, 2 * hidden:] + b_hn))
    return (1.0 - z) * n + z * h


def gru_recurrent_seq_kernel(g_ref, w_h_ref, b_hn_ref, out_ref, h_ref,
                             *, seq_len, t_blk, hidden):
    """Recurrence over one (Bblk, Tblk, 3H) chunk; emits the full hidden sequence."""
    c = pl.program_id(1)  # time-chunk index (sequential / "arbitrary")

    @pl.when(c == 0)
    def _():
        h_ref[...] = jnp.zeros_like(h_ref)

    w_h = w_h_ref[...]        # (H, 3H), VMEM-resident across all grid steps
    b_hn = b_hn_ref[...]      # (1, H)

    n_valid = jnp.minimum(t_blk, seq_len - c * t_blk)

    @pl.loop(0, n_valid)
    def _(t):
        g_t = g_ref[:, pl.ds(t, 1), :][:, 0, :]                     # (Bblk, 3H)
        h_new = _gru_step(g_t, h_ref[...], w_h, b_hn, hidden)
        h_ref[...] = h_new
        out_ref[:, pl.ds(t, 1), :] = h_new[:, None, :].astype(out_ref.dtype)


def gru_recurrent_last_kernel(g_ref, w_h_ref, b_hn_ref, w_fc_ref, b_fc_ref,
                              out_ref, h_ref, *, seq_len, t_blk, hidden):
    """Last GRU layer with the fc fused: only the (Bblk, out_dim) result is written."""
    c = pl.program_id(1)

    @pl.when(c == 0)
    def _():
        h_ref[...] = jnp.zeros_like(h_ref)

    w_h = w_h_ref[...]
    b_hn = b_hn_ref[...]

    n_valid = jnp.minimum(t_blk, seq_len - c * t_blk)

    @pl.loop(0, n_valid)
    def _(t):
        g_t = g_ref[:, pl.ds(t, 1), :][:, 0, :]
        h_ref[...] = _gru_step(g_t, h_ref[...], w_h, b_hn, hidden)

    @pl.when(c == pl.num_programs(1) - 1)
    def _():
        out_ref[...] = (
            jnp.dot(h_ref[...], w_fc_ref[...], preferred_element_type=jnp.float32)
            + b_fc_ref[...]
        ).astype(out_ref.dtype)


# ----------------------------------------------------------------------------
# Wrappers
# ----------------------------------------------------------------------------
def input_projection(x_2d, w_i, b_i):
    """(M, Din) @ (Din, 3H) + b, tiled over rows.  One big non-recurrent matmul."""
    M, Din = x_2d.shape
    G3 = w_i.shape[1]
    tm = M if M <= 512 else 512
    grid = (pl.cdiv(M, tm),)
    return pl.pallas_call(
        input_proj_kernel,
        out_shape=jax.ShapeDtypeStruct((M, G3), jnp.float32),
        grid_spec=pltpu.PrefetchScalarGridSpec(
            num_scalar_prefetch=0,
            grid=grid,
            in_specs=[
                pl.BlockSpec((tm, Din), lambda i: (i, 0)),
                pl.BlockSpec((Din, G3), lambda i: (0, 0)),
                pl.BlockSpec((1, G3), lambda i: (0, 0)),
            ],
            out_specs=pl.BlockSpec((tm, G3), lambda i: (i, 0)),
        ),
        compiler_params=pltpu.CompilerParams(dimension_semantics=("parallel",)),
    )(x_2d, w_i, b_i)


def gru_recurrent(g_bt3h, w_h, b_hn, *, w_fc=None, b_fc=None):
    """Run the GRU recurrence over precomputed gates G (B, T, 3H).

    If w_fc/b_fc are given, the final Linear is fused and only (B, out_dim) is returned;
    otherwise the full hidden sequence (B, T, H) is returned (input to the next layer)."""
    B, T, G3 = g_bt3h.shape
    H = w_h.shape[0]
    b_blk = B if B <= _MAX_B_BLOCK else _MAX_B_BLOCK
    t_blk = T if T <= _MAX_T_BLOCK else _MAX_T_BLOCK
    nb = pl.cdiv(B, b_blk)
    nc = pl.cdiv(T, t_blk)

    if w_fc is None:
        kernel = functools.partial(gru_recurrent_seq_kernel,
                                   seq_len=T, t_blk=t_blk, hidden=H)
        grid_spec = pltpu.PrefetchScalarGridSpec(
            num_scalar_prefetch=0,
            grid=(nb, nc),
            in_specs=[
                pl.BlockSpec((b_blk, t_blk, G3), lambda b, c: (b, c, 0)),
                pl.BlockSpec((H, G3), lambda b, c: (0, 0)),
                pl.BlockSpec((1, H), lambda b, c: (0, 0)),
            ],
            out_specs=pl.BlockSpec((b_blk, t_blk, H), lambda b, c: (b, c, 0)),
            scratch_shapes=[pltpu.VMEM((b_blk, H), jnp.float32)],
        )
        return pl.pallas_call(
            kernel,
            out_shape=jax.ShapeDtypeStruct((B, T, H), jnp.float32),
            grid_spec=grid_spec,
            compiler_params=pltpu.CompilerParams(
                dimension_semantics=("parallel", "arbitrary")),
        )(g_bt3h, w_h, b_hn)

    O = w_fc.shape[1]
    kernel = functools.partial(gru_recurrent_last_kernel,
                               seq_len=T, t_blk=t_blk, hidden=H)
    grid_spec = pltpu.PrefetchScalarGridSpec(
        num_scalar_prefetch=0,
        grid=(nb, nc),
        in_specs=[
            pl.BlockSpec((b_blk, t_blk, G3), lambda b, c: (b, c, 0)),
            pl.BlockSpec((H, G3), lambda b, c: (0, 0)),
            pl.BlockSpec((1, H), lambda b, c: (0, 0)),
            pl.BlockSpec((H, O), lambda b, c: (0, 0)),
            pl.BlockSpec((1, O), lambda b, c: (0, 0)),
        ],
        out_specs=pl.BlockSpec((b_blk, O), lambda b, c: (b, 0)),
        scratch_shapes=[pltpu.VMEM((b_blk, H), jnp.float32)],
    )
    return pl.pallas_call(
        kernel,
        out_shape=jax.ShapeDtypeStruct((B, O), jnp.float32),
        grid_spec=grid_spec,
        compiler_params=pltpu.CompilerParams(
            dimension_semantics=("parallel", "arbitrary")),
    )(g_bt3h, w_h, b_hn, w_fc, b_fc)


@jax.jit
def gru_submodel_forward(x_btd, layer_params, w_fc, b_fc):
    """Forward pass of GRUSubmodel.  x_btd: (B, T, input_dim) -> (B, 5)."""
    B, T, _ = x_btd.shape
    n_layers = len(layer_params)
    h = x_btd                                              # batch_first throughout
    out = None
    for li, p in enumerate(layer_params):
        Din = h.shape[-1]
        H = p["w_h"].shape[0]
        # Non-recurrent input projection for the whole sequence: one (B*T,Din)@(Din,3H).
        g = input_projection(h.reshape(B * T, Din), p["w_i"], p["b_i"])
        g = g.reshape(B, T, 3 * H)
        if li == n_layers - 1:
            out = gru_recurrent(g, p["w_h"], p["b_hn"], w_fc=w_fc, b_fc=b_fc)
        else:
            h = gru_recurrent(g, p["w_h"], p["b_hn"])
    return out


# ----------------------------------------------------------------------------
# Deterministic parameter init (PyTorch-style U(-1/sqrt(H), 1/sqrt(H)), packed layout)
# ----------------------------------------------------------------------------
def init_params(key, input_dim, hidden_dim, num_layers, out_dim=5):
    k = 1.0 / jnp.sqrt(jnp.float32(hidden_dim))
    layer_params = []
    for layer in range(num_layers):
        d_in = input_dim if layer == 0 else hidden_dim
        keys = jax.random.split(jax.random.fold_in(key, layer), 12)
        u = lambda kk, shape: jax.random.uniform(
            kk, shape, jnp.float32, minval=-k, maxval=k)
        w_ir, w_iz, w_in = (u(keys[i], (d_in, hidden_dim)) for i in range(3))
        w_hr, w_hz, w_hn = (u(keys[3 + i], (hidden_dim, hidden_dim)) for i in range(3))
        b_ir, b_iz, b_in = (u(keys[6 + i], (1, hidden_dim)) for i in range(3))
        b_hr, b_hz, b_hn = (u(keys[9 + i], (1, hidden_dim)) for i in range(3))
        layer_params.append(
            dict(
                w_i=jnp.concatenate([w_ir, w_iz, w_in], axis=1),          # (Din, 3H)
                w_h=jnp.concatenate([w_hr, w_hz, w_hn], axis=1),          # (H, 3H)
                b_i=jnp.concatenate(                                       # (1, 3H)
                    [b_ir + b_hr, b_iz + b_hz, b_in], axis=1),
                b_hn=b_hn,                                                 # (1, H)
            )
        )
    kfc_w, kfc_b = jax.random.split(jax.random.fold_in(key, 1000))
    kf = 1.0 / jnp.sqrt(jnp.float32(hidden_dim))
    w_fc = jax.random.uniform(kfc_w, (hidden_dim, out_dim), jnp.float32, -kf, kf)
    b_fc = jax.random.uniform(kfc_b, (1, out_dim), jnp.float32, -kf, kf)
    return layer_params, w_fc, b_fc


# ----------------------------------------------------------------------------
# Pure-JAX reference (for correctness check)
# ----------------------------------------------------------------------------
def gru_submodel_ref(x_btd, layer_params, w_fc, b_fc):
    B = x_btd.shape[0]
    h_seq = jnp.transpose(x_btd, (1, 0, 2))  # (T, B, D)
    for p in layer_params:
        H = p["w_h"].shape[0]

        def step(h, x_t, p=p, H=H):
            g = x_t @ p["w_i"] + p["b_i"]
            hw = h @ p["w_h"]
            r = jax.nn.sigmoid(g[:, :H] + hw[:, :H])
            z = jax.nn.sigmoid(g[:, H:2 * H] + hw[:, H:2 * H])
            n = jnp.tanh(g[:, 2 * H:] + r * (hw[:, 2 * H:] + p["b_hn"]))
            h_new = (1.0 - z) * n + z * h
            return h_new, h_new

        h0 = jnp.zeros((B, H), jnp.float32)
        _, h_seq = jax.lax.scan(step, h0, h_seq)
    return h_seq[-1] @ w_fc + b_fc


# ----------------------------------------------------------------------------
if __name__ == "__main__":
    input_dim, hidden_dim, num_layers = 8, 32, 2
    batch, seq = 2, 8

    key = jax.random.PRNGKey(0)
    kx, kp = jax.random.split(key)
    x = jax.random.normal(kx, (batch, seq, input_dim), jnp.float32)

    layer_params, w_fc, b_fc = init_params(kp, input_dim, hidden_dim, num_layers)

    out = gru_submodel_forward(x, layer_params, w_fc, b_fc)
    out = jax.block_until_ready(out)

    ref = gru_submodel_ref(x, layer_params, w_fc, b_fc)
    assert out.shape == (batch, 5), out.shape
    assert jnp.allclose(out, ref, atol=1e-4, rtol=1e-4), (out, ref)

    print("KERNEL_OK")
</pallas_src>

<mosaic_0001>
module attributes {stable_mosaic.version = 11 : i64} {
  func.func @input_proj_kernel(%arg0: i32, %arg1: memref<16x8xf32, #tpu.memory_space<vmem>>, %arg2: memref<8x96xf32, #tpu.memory_space<vmem>>, %arg3: memref<1x96xf32, #tpu.memory_space<vmem>>, %arg4: memref<16x96xf32, #tpu.memory_space<vmem>>) attributes {dimension_semantics = [#tpu.dimension_semantics<parallel>], iteration_bounds = array<i64: 1>, scalar_prefetch = 0 : i64, scratch_operands = 0 : i64, tpu.core_type = #tpu.core_type<tc>, window_params = [{transform_indices = @transform_0, window_bounds = array<i64: 16, 8>}, {pipeline_mode = #tpu.pipeline_mode<synchronous>, transform_indices = @transform_1, window_bounds = array<i64: 8, 96>}, {pipeline_mode = #tpu.pipeline_mode<synchronous>, transform_indices = @transform_2, window_bounds = array<i64: 1, 96>}, {transform_indices = @transform_3, window_bounds = array<i64: 16, 96>}]} {
    %c0 = arith.constant 0 : index
    %c0_0 = arith.constant 0 : index
    %0 = vector.load %arg1[%c0, %c0_0] : memref<16x8xf32, #tpu.memory_space<vmem>>, vector<16x8xf32>
    %c0_1 = arith.constant 0 : index
    %c0_2 = arith.constant 0 : index
    %1 = vector.load %arg2[%c0_1, %c0_2] : memref<8x96xf32, #tpu.memory_space<vmem>>, vector<8x96xf32>
    %cst = arith.constant dense<0.000000e+00> : vector<16x96xf32>
    %2 = tpu.matmul %0, %1, %cst {dimension_numbers = #tpu.dot_dimension_numbers<[1], [0], [0], [1], [0, 0, 1, 1], [], []>} : vector<16x8xf32>, vector<8x96xf32>, vector<16x96xf32> -> vector<16x96xf32>
    %c0_3 = arith.constant 0 : index
    %c0_4 = arith.constant 0 : index
    %3 = vector.load %arg3[%c0_3, %c0_4] : memref<1x96xf32, #tpu.memory_space<vmem>>, vector<1x96xf32>
    %4 = vector.broadcast %3 : vector<1x96xf32> to vector<16x96xf32>
    %5 = arith.addf %2, %4 : vector<16x96xf32>
    %c0_5 = arith.constant 0 : index
    %c0_6 = arith.constant 0 : index
    %6 = vector.load %arg4[%c0_5, %c0_6] : memref<16x96xf32, #tpu.memory_space<vmem>>, vector<16x96xf32>
    tpu.vector_store %arg4[%c0_5, %c0_6], %5 {strides = array<i32>} : memref<16x96xf32, #tpu.memory_space<vmem>>, vector<16x96xf32>,
    return
  }
  func.func @transform_0(%arg0: i32) -> (i32, i32) {
    %c0_i32 = arith.constant 0 : i32
    %c0_i32_0 = arith.constant 0 : i32
    return %arg0, %c0_i32 : i32, i32
  }
  func.func @transform_1(%arg0: i32) -> (i32, i32) {
    %c0_i32 = arith.constant 0 : i32
    %c0_i32_0 = arith.constant 0 : i32
    %c0_i32_1 = arith.constant 0 : i32
    return %c0_i32, %c0_i32_0 : i32, i32
  }
  func.func @transform_2(%arg0: i32) -> (i32, i32) {
    %c0_i32 = arith.constant 0 : i32
    %c0_i32_0 = arith.constant 0 : i32
    %c0_i32_1 = arith.constant 0 : i32
    return %c0_i32, %c0_i32_0 : i32, i32
  }
  func.func @transform_3(%arg0: i32) -> (i32, i32) {
    %c0_i32 = arith.constant 0 : i32
    %c0_i32_0 = arith.constant 0 : i32
    return %arg0, %c0_i32 : i32, i32
  }
}

module attributes {stable_mosaic.version = 11 : i64} {
  func.func @input_proj_kernel(%arg0: i32, %arg1: memref<16x32xf32, #tpu.memory_space<vmem>>, %arg2: memref<32x96xf32, #tpu.memory_space<vmem>>, %arg3: memref<1x96xf32, #tpu.memory_space<vmem>>, %arg4: memref<16x96xf32, #tpu.memory_space<vmem>>) attributes {dimension_semantics = [#tpu.dimension_semantics<parallel>], iteration_bounds = array<i64: 1>, scalar_prefetch = 0 : i64, scratch_operands = 0 : i64, tpu.core_type = #tpu.core_type<tc>, window_params = [{transform_indices = @transform_0, window_bounds = array<i64: 16, 32>}, {pipeline_mode = #tpu.pipeline_mode<synchronous>, transform_indices = @transform_1, window_bounds = array<i64: 32, 96>}, {pipeline_mode = #tpu.pipeline_mode<synchronous>, transform_indices = @transform_2, window_bounds = array<i64: 1, 96>}, {transform_indices = @transform_3, window_bounds = array<i64: 16, 96>}]} {
    %c0 = arith.constant 0 : index
    %c0_0 = arith.constant 0 : index
    %0 = vector.load %arg1[%c0, %c0_0] : memref<16x32xf32, #tpu.memory_space<vmem>>, vector<16x32xf32>
    %c0_1 = arith.constant 0 : index
    %c0_2 = arith.constant 0 : index
    %1 = vector.load %arg2[%c0_1, %c0_2] : memref<32x96xf32, #tpu.memory_space<vmem>>, vector<32x96xf32>
    %cst = arith.constant dense<0.000000e+00> : vector<16x96xf32>
    %2 = tpu.matmul %0, %1, %cst {dimension_numbers = #tpu.dot_dimension_numbers<[1], [0], [0], [1], [0, 0, 1, 1], [], []>} : vector<16x32xf32>, vector<32x96xf32>, vector<16x96xf32> -> vector<16x96xf32>
    %c0_3 = arith.constant 0 : index
    %c0_4 = arith.constant 0 : index
    %3 = vector.load %arg3[%c0_3, %c0_4] : memref<1x96xf32, #tpu.memory_space<vmem>>, vector<1x96xf32>
    %4 = vector.broadcast %3 : vector<1x96xf32> to vector<16x96xf32>
    %5 = arith.addf %2, %4 : vector<16x96xf32>
    %c0_5 = arith.constant 0 : index
    %c0_6 = arith.constant 0 : index
    %6 = vector.load %arg4[%c0_5, %c0_6] : memref<16x96xf32, #tpu.memory_space<vmem>>, vector<16x96xf32>
    tpu.vector_store %arg4[%c0_5, %c0_6], %5 {strides = array<i32>} : memref<16x96xf32, #tpu.memory_space<vmem>>, vector<16x96xf32>,
    return
  }
  func.func @transform_0(%arg0: i32) -> (i32, i32) {
    %c0_i32 = arith.constant 0 : i32
    %c0_i32_0 = arith.constant 0 : i32
    return %arg0, %c0_i32 : i32, i32
  }
  func.func @transform_1(%arg0: i32) -> (i32, i32) {
    %c0_i32 = arith.constant 0 : i32
    %c0_i32_0 = arith.constant 0 : i32
    %c0_i32_1 = arith.constant 0 : i32
    return %c0_i32, %c0_i32_0 : i32, i32
  }
  func.func @transform_2(%arg0: i32) -> (i32, i32) {
    %c0_i32 = arith.constant 0 : i32
    %c0_i32_0 = arith.constant 0 : i32
    %c0_i32_1 = arith.constant 0 : i32
    return %c0_i32, %c0_i32_0 : i32, i32
  }
  func.func @transform_3(%arg0: i32) -> (i32, i32) {
    %c0_i32 = arith.constant 0 : i32
    %c0_i32_0 = arith.constant 0 : i32
    return %arg0, %c0_i32 : i32, i32
  }
}

module attributes {stable_mosaic.version = 11 : i64} {
  func.func @gru_recurrent_seq_kernel(%arg0: i32, %arg1: i32, %arg2: memref<2x8x96xf32, #tpu.memory_space<vmem>>, %arg3: memref<32x96xf32, #tpu.memory_space<vmem>>, %arg4: memref<1x32xf32, #tpu.memory_space<vmem>>, %arg5: memref<2x8x32xf32, #tpu.memory_space<vmem>>, %arg6: memref<2x32xf32, #tpu.memory_space<vmem>>) attributes {dimension_semantics = [#tpu.dimension_semantics<parallel>, #tpu.dimension_semantics<arbitrary>], iteration_bounds = array<i64: 1, 1>, scalar_prefetch = 0 : i64, scratch_operands = 1 : i64, tpu.core_type = #tpu.core_type<tc>, window_params = [{transform_indices = @transform_0, window_bounds = array<i64: 2, 8, 96>}, {pipeline_mode = #tpu.pipeline_mode<synchronous>, transform_indices = @transform_1, window_bounds = array<i64: 32, 96>}, {pipeline_mode = #tpu.pipeline_mode<synchronous>, transform_indices = @transform_2, window_bounds = array<i64: 1, 32>}, {transform_indices = @transform_3, window_bounds = array<i64: 2, 8, 32>}]} {
    %c0_i32 = arith.constant 0 : i32
    %0 = arith.cmpi eq, %arg1, %c0_i32 : i32
    %1 = arith.extui %0 : i1 to i32
    %c0_i32_0 = arith.constant 0 : i32
    %2 = arith.cmpi ne, %1, %c0_i32_0 : i32
    scf.if %2 {
      %cst = arith.constant 0.000000e+00 : f32
      %14 = vector.broadcast %cst : f32 to vector<2x32xf32>
      %c0_13 = arith.constant 0 : index
      %c0_14 = arith.constant 0 : index
      %15 = vector.load %arg6[%c0_13, %c0_14] : memref<2x32xf32, #tpu.memory_space<vmem>>, vector<2x32xf32>
      tpu.vector_store %arg6[%c0_13, %c0_14], %14 {strides = array<i32>} : memref<2x32xf32, #tpu.memory_space<vmem>>, vector<2x32xf32>,
    } else {
    }
    %c0 = arith.constant 0 : index
    %c0_1 = arith.constant 0 : index
    %3 = vector.load %arg3[%c0, %c0_1] : memref<32x96xf32, #tpu.memory_space<vmem>>, vector<32x96xf32>
    %c0_2 = arith.constant 0 : index
    %c0_3 = arith.constant 0 : index
    %4 = vector.load %arg4[%c0_2, %c0_3] : memref<1x32xf32, #tpu.memory_space<vmem>>, vector<1x32xf32>
    %c8_i32 = arith.constant 8 : i32
    %5 = arith.muli %arg1, %c8_i32 : i32
    %c8_i32_4 = arith.constant 8 : i32
    %6 = arith.subi %c8_i32_4, %5 : i32
    %c8_i32_5 = arith.constant 8 : i32
    %7 = arith.minsi %c8_i32_5, %6 : i32
    %c0_i32_6 = arith.constant 0 : i32
    %8 = arith.subi %7, %c0_i32_6 : i32
    %c1_i32 = arith.constant 1 : i32
    %c1_i32_7 = arith.constant 1 : i32
    %9 = arith.subi %c1_i32, %c1_i32_7 : i32
    %10 = arith.addi %8, %9 : i32
    %c1_i32_8 = arith.constant 1 : i32
    %11 = arith.divsi %10, %c1_i32_8 : i32
    %c1_i32_9 = arith.constant 1 : i32
    %c0_i32_10 = arith.constant 0 : i32
    %c0_i32_11 = arith.constant 0 : i32
    %12 = arith.subi %11, %c0_i32_11 : i32
    %13 = arith.addi %c0_i32_11, %12 : i32
    %c1_i32_12 = arith.constant 1 : i32
    scf.for %arg7 = %c0_i32_11 to %13 step %c1_i32_12  : i32 {
      %14 = arith.muli %arg7, %c1_i32_9 : i32
      %15 = arith.addi %c0_i32_10, %14 : i32
      %c0_13 = arith.constant 0 : index
      %16 = arith.index_cast %15 : i32 to index
      %c0_14 = arith.constant 0 : index
      %17 = vector.load %arg2[%c0_13, %16, %c0_14] : memref<2x8x96xf32, #tpu.memory_space<vmem>>, vector<2x1x96xf32>
      %18 = vector.shape_cast %17 : vector<2x1x96xf32> to vector<2x96xf32>
      %c0_15 = arith.constant 0 : index
      %c0_16 = arith.constant 0 : index
      %19 = vector.load %arg6[%c0_15, %c0_16] : memref<2x32xf32, #tpu.memory_space<vmem>>, vector<2x32xf32>
      %cst = arith.constant dense<0.000000e+00> : vector<2x96xf32>
      %20 = tpu.matmul %19, %3, %cst {dimension_numbers = #tpu.dot_dimension_numbers<[1], [0], [0], [1], [0, 0, 1, 1], [], []>} : vector<2x32xf32>, vector<32x96xf32>, vector<2x96xf32> -> vector<2x96xf32>
      %21 = vector.extract_strided_slice %18 {offsets = [0, 0], sizes = [2, 32], strides = [1, 1]} : vector<2x96xf32> to vector<2x32xf32>
      %22 = vector.extract_strided_slice %20 {offsets = [0, 0], sizes = [2, 32], strides = [1, 1]} : vector<2x96xf32> to vector<2x32xf32>
      %23 = arith.addf %21, %22 : vector<2x32xf32>
      %24 = arith.negf %23 : vector<2x32xf32>
      %25 = math.exp %24 : vector<2x32xf32>
      %cst_17 = arith.constant 1.000000e+00 : f32
      %26 = vector.broadcast %cst_17 : f32 to vector<2x32xf32>
      %27 = arith.addf %26, %25 : vector<2x32xf32>
      %28 = arith.divf %26, %27 : vector<2x32xf32>
      %29 = vector.extract_strided_slice %18 {offsets = [0, 32], sizes = [2, 32], strides = [1, 1]} : vector<2x96xf32> to vector<2x32xf32>
      %30 = vector.extract_strided_slice %20 {offsets = [0, 32], sizes = [2, 32], strides = [1, 1]} : vector<2x96xf32> to vector<2x32xf32>
      %31 = arith.addf %29, %30 : vector<2x32xf32>
      %32 = arith.negf %31 : vector<2x32xf32>
      %33 = math.exp %32 : vector<2x32xf32>
      %cst_18 = arith.constant 1.000000e+00 : f32
      %34 = vector.broadcast %cst_18 : f32 to vector<2x32xf32>
      %35 = arith.addf %34, %33 : vector<2x32xf32>
      %36 = arith.divf %34, %35 : vector<2x32xf32>
      %37 = vector.extract_strided_slice %18 {offsets = [0, 64], sizes = [2, 32], strides = [1, 1]} : vector<2x96xf32> to vector<2x32xf32>
      %38 = vector.extract_strided_slice %20 {offsets = [0, 64], sizes = [2, 32], strides = [1, 1]} : vector<2x96xf32> to vector<2x32xf32>
      %39 = vector.broadcast %4 : vector<1x32xf32> to vector<2x32xf32>
      %40 = arith.addf %38, %39 : vector<2x32xf32>
      %41 = arith.mulf %28, %40 : vector<2x32xf32>
      %42 = arith.addf %37, %41 : vector<2x32xf32>
      %43 = math.tanh %42 : vector<2x32xf32>
      %cst_19 = arith.constant 1.000000e+00 : f32
      %44 = vector.broadcast %cst_19 : f32 to vector<2x32xf32>
      %45 = arith.subf %44, %36 : vector<2x32xf32>
      %46 = arith.mulf %45, %43 : vector<2x32xf32>
      %47 = arith.mulf %36, %19 : vector<2x32xf32>
      %48 = arith.addf %46, %47 : vector<2x32xf32>
      %c0_20 = arith.constant 0 : index
      %c0_21 = arith.constant 0 : index
      %49 = vector.load %arg6[%c0_20, %c0_21] : memref<2x32xf32, #tpu.memory_space<vmem>>, vector<2x32xf32>
      tpu.vector_store %arg6[%c0_20, %c0_21], %48 {strides = array<i32>} : memref<2x32xf32, #tpu.memory_space<vmem>>, vector<2x32xf32>,
      %50 = vector.shape_cast %48 : vector<2x32xf32> to vector<2x1x32xf32>
      %c0_22 = arith.constant 0 : index
      %51 = arith.index_cast %15 : i32 to index
      %c0_23 = arith.constant 0 : index
      %52 = vector.load %arg5[%c0_22, %51, %c0_23] : memref<2x8x32xf32, #tpu.memory_space<vmem>>, vector<2x1x32xf32>
      tpu.vector_store %arg5[%c0_22, %51, %c0_23], %50 {strides = array<i32>} : memref<2x8x32xf32, #tpu.memory_space<vmem>>, vector<2x1x32xf32>,
    }
    return
  }
  func.func @transform_0(%arg0: i32, %arg1: i32) -> (i32, i32, i32) {
    %c0_i32 = arith.constant 0 : i32
    %c0_i32_0 = arith.constant 0 : i32
    return %arg0, %arg1, %c0_i32 : i32, i32, i32
  }
  func.func @transform_1(%arg0: i32, %arg1: i32) -> (i32, i32) {
    %c0_i32 = arith.constant 0 : i32
    %c0_i32_0 = arith.constant 0 : i32
    %c0_i32_1 = arith.constant 0 : i32
    return %c0_i32, %c0_i32_0 : i32, i32
  }
  func.func @transform_2(%arg0: i32, %arg1: i32) -> (i32, i32) {
    %c0_i32 = arith.constant 0 : i32
    %c0_i32_0 = arith.constant 0 : i32
    %c0_i32_1 = arith.constant 0 : i32
    return %c0_i32, %c0_i32_0 : i32, i32
  }
  func.func @transform_3(%arg0: i32, %arg1: i32) -> (i32, i32, i32) {
    %c0_i32 = arith.constant 0 : i32
    %c0_i32_0 = arith.constant 0 : i32
    return %arg0, %arg1, %c0_i32 : i32, i32, i32
  }
}

module attributes {stable_mosaic.version = 11 : i64} {
  func.func @gru_recurrent_last_kernel(%arg0: i32, %arg1: i32, %arg2: memref<2x8x96xf32, #tpu.memory_space<vmem>>, %arg3: memref<32x96xf32, #tpu.memory_space<vmem>>, %arg4: memref<1x32xf32, #tpu.memory_space<vmem>>, %arg5: memref<32x5xf32, #tpu.memory_space<vmem>>, %arg6: memref<1x5xf32, #tpu.memory_space<vmem>>, %arg7: memref<2x5xf32, #tpu.memory_space<vmem>>, %arg8: memref<2x32xf32, #tpu.memory_space<vmem>>) attributes {dimension_semantics = [#tpu.dimension_semantics<parallel>, #tpu.dimension_semantics<arbitrary>], iteration_bounds = array<i64: 1, 1>, scalar_prefetch = 0 : i64, scratch_operands = 1 : i64, tpu.core_type = #tpu.core_type<tc>, window_params = [{transform_indices = @transform_0, window_bounds = array<i64: 2, 8, 96>}, {pipeline_mode = #tpu.pipeline_mode<synchronous>, transform_indices = @transform_1, window_bounds = array<i64: 32, 96>}, {pipeline_mode = #tpu.pipeline_mode<synchronous>, transform_indices = @transform_2, window_bounds = array<i64: 1, 32>}, {pipeline_mode = #tpu.pipeline_mode<synchronous>, transform_indices = @transform_3, window_bounds = array<i64: 32, 5>}, {pipeline_mode = #tpu.pipeline_mode<synchronous>, transform_indices = @transform_4, window_bounds = array<i64: 1, 5>}, {transform_indices = @transform_5, window_bounds = array<i64: 2, 5>}]} {
    %c0_i32 = arith.constant 0 : i32
    %0 = arith.cmpi eq, %arg1, %c0_i32 : i32
    %1 = arith.extui %0 : i1 to i32
    %c0_i32_0 = arith.constant 0 : i32
    %2 = arith.cmpi ne, %1, %c0_i32_0 : i32
    scf.if %2 {
      %cst = arith.constant 0.000000e+00 : f32
      %17 = vector.broadcast %cst : f32 to vector<2x32xf32>
      %c0_15 = arith.constant 0 : index
      %c0_16 = arith.constant 0 : index
      %18 = vector.load %arg8[%c0_15, %c0_16] : memref<2x32xf32, #tpu.memory_space<vmem>>, vector<2x32xf32>
      tpu.vector_store %arg8[%c0_15, %c0_16], %17 {strides = array<i32>} : memref<2x32xf32, #tpu.memory_space<vmem>>, vector<2x32xf32>,
    } else {
    }
    %c0 = arith.constant 0 : index
    %c0_1 = arith.constant 0 : index
    %3 = vector.load %arg3[%c0, %c0_1] : memref<32x96xf32, #tpu.memory_space<vmem>>, vector<32x96xf32>
    %c0_2 = arith.constant 0 : index
    %c0_3 = arith.constant 0 : index
    %4 = vector.load %arg4[%c0_2, %c0_3] : memref<1x32xf32, #tpu.memory_space<vmem>>, vector<1x32xf32>
    %c8_i32 = arith.constant 8 : i32
    %5 = arith.muli %arg1, %c8_i32 : i32
    %c8_i32_4 = arith.constant 8 : i32
    %6 = arith.subi %c8_i32_4, %5 : i32
    %c8_i32_5 = arith.constant 8 : i32
    %7 = arith.minsi %c8_i32_5, %6 : i32
    %c0_i32_6 = arith.constant 0 : i32
    %8 = arith.subi %7, %c0_i32_6 : i32
    %c1_i32 = arith.constant 1 : i32
    %c1_i32_7 = arith.constant 1 : i32
    %9 = arith.subi %c1_i32, %c1_i32_7 : i32
    %10 = arith.addi %8, %9 : i32
    %c1_i32_8 = arith.constant 1 : i32
    %11 = arith.divsi %10, %c1_i32_8 : i32
    %c1_i32_9 = arith.constant 1 : i32
    %c0_i32_10 = arith.constant 0 : i32
    %c0_i32_11 = arith.constant 0 : i32
    %12 = arith.subi %11, %c0_i32_11 : i32
    %13 = arith.addi %c0_i32_11, %12 : i32
    %c1_i32_12 = arith.constant 1 : i32
    scf.for %arg9 = %c0_i32_11 to %13 step %c1_i32_12  : i32 {
      %17 = arith.muli %arg9, %c1_i32_9 : i32
      %18 = arith.addi %c0_i32_10, %17 : i32
      %c0_15 = arith.constant 0 : index
      %19 = arith.index_cast %18 : i32 to index
      %c0_16 = arith.constant 0 : index
      %20 = vector.load %arg2[%c0_15, %19, %c0_16] : memref<2x8x96xf32, #tpu.memory_space<vmem>>, vector<2x1x96xf32>
      %21 = vector.shape_cast %20 : vector<2x1x96xf32> to vector<2x96xf32>
      %c0_17 = arith.constant 0 : index
      %c0_18 = arith.constant 0 : index
      %22 = vector.load %arg8[%c0_17, %c0_18] : memref<2x32xf32, #tpu.memory_space<vmem>>, vector<2x32xf32>
      %cst = arith.constant dense<0.000000e+00> : vector<2x96xf32>
      %23 = tpu.matmul %22, %3, %cst {dimension_numbers = #tpu.dot_dimension_numbers<[1], [0], [0], [1], [0, 0, 1, 1], [], []>} : vector<2x32xf32>, vector<32x96xf32>, vector<2x96xf32> -> vector<2x96xf32>
      %24 = vector.extract_strided_slice %21 {offsets = [0, 0], sizes = [2, 32], strides = [1, 1]} : vector<2x96xf32> to vector<2x32xf32>
      %25 = vector.extract_strided_slice %23 {offsets = [0, 0], sizes = [2, 32], strides = [1, 1]} : vector<2x96xf32> to vector<2x32xf32>
      %26 = arith.addf %24, %25 : vector<2x32xf32>
      %27 = arith.negf %26 : vector<2x32xf32>
      %28 = math.exp %27 : vector<2x32xf32>
      %cst_19 = arith.constant 1.000000e+00 : f32
      %29 = vector.broadcast %cst_19 : f32 to vector<2x32xf32>
      %30 = arith.addf %29, %28 : vector<2x32xf32>
      %31 = arith.divf %29, %30 : vector<2x32xf32>
      %32 = vector.extract_strided_slice %21 {offsets = [0, 32], sizes = [2, 32], strides = [1, 1]} : vector<2x96xf32> to vector<2x32xf32>
      %33 = vector.extract_strided_slice %23 {offsets = [0, 32], sizes = [2, 32], strides = [1, 1]} : vector<2x96xf32> to vector<2x32xf32>
      %34 = arith.addf %32, %33 : vector<2x32xf32>
      %35 = arith.negf %34 : vector<2x32xf32>
      %36 = math.exp %35 : vector<2x32xf32>
      %cst_20 = arith.constant 1.000000e+00 : f32
      %37 = vector.broadcast %cst_20 : f32 to vector<2x32xf32>
      %38 = arith.addf %37, %36 : vector<2x32xf32>
      %39 = arith.divf %37, %38 : vector<2x32xf32>
      %40 = vector.extract_strided_slice %21 {offsets = [0, 64], sizes = [2, 32], strides = [1, 1]} : vector<2x96xf32> to vector<2x32xf32>
      %41 = vector.extract_strided_slice %23 {offsets = [0, 64], sizes = [2, 32], strides = [1, 1]} : vector<2x96xf32> to vector<2x32xf32>
      %42 = vector.broadcast %4 : vector<1x32xf32> to vector<2x32xf32>
      %43 = arith.addf %41, %42 : vector<2x32xf32>
      %44 = arith.mulf %31, %43 : vector<2x32xf32>
      %45 = arith.addf %40, %44 : vector<2x32xf32>
      %46 = math.tanh %45 : vector<2x32xf32>
      %cst_21 = arith.constant 1.000000e+00 : f32
      %47 = vector.broadcast %cst_21 : f32 to vector<2x32xf32>
      %48 = arith.subf %47, %39 : vector<2x32xf32>
      %49 = arith.mulf %48, %46 : vector<2x32xf32>
      %50 = arith.mulf %39, %22 : vector<2x32xf32>
      %51 = arith.addf %49, %50 : vector<2x32xf32>
      %c0_22 = arith.constant 0 : index
      %c0_23 = arith.constant 0 : index
      %52 = vector.load %arg8[%c0_22, %c0_23] : memref<2x32xf32, #tpu.memory_space<vmem>>, vector<2x32xf32>
      tpu.vector_store %arg8[%c0_22, %c0_23], %51 {strides = array<i32>} : memref<2x32xf32, #tpu.memory_space<vmem>>, vector<2x32xf32>,
    }
    %c0_i32_13 = arith.constant 0 : i32
    %14 = arith.cmpi eq, %arg1, %c0_i32_13 : i32
    %15 = arith.extui %14 : i1 to i32
    %c0_i32_14 = arith.constant 0 : i32
    %16 = arith.cmpi ne, %15, %c0_i32_14 : i32
    scf.if %16 {
      %c0_15 = arith.constant 0 : index
      %c0_16 = arith.constant 0 : index
      %17 = vector.load %arg8[%c0_15, %c0_16] : memref<2x32xf32, #tpu.memory_space<vmem>>, vector<2x32xf32>
      %c0_17 = arith.constant 0 : index
      %c0_18 = arith.constant 0 : index
      %18 = vector.load %arg5[%c0_17, %c0_18] : memref<32x5xf32, #tpu.memory_space<vmem>>, vector<32x5xf32>
      %cst = arith.constant dense<0.000000e+00> : vector<2x5xf32>
      %19 = tpu.matmul %17, %18, %cst {dimension_numbers = #tpu.dot_dimension_numbers<[1], [0], [0], [1], [0, 0, 1, 1], [], []>} : vector<2x32xf32>, vector<32x5xf32>, vector<2x5xf32> -> vector<2x5xf32>
      %c0_19 = arith.constant 0 : index
      %c0_20 = arith.constant 0 : index
      %20 = vector.load %arg6[%c0_19, %c0_20] : memref<1x5xf32, #tpu.memory_space<vmem>>, vector<1x5xf32>
      %21 = vector.broadcast %20 : vector<1x5xf32> to vector<2x5xf32>
      %22 = arith.addf %19, %21 : vector<2x5xf32>
      %c0_21 = arith.constant 0 : index
      %c0_22 = arith.constant 0 : index
      %23 = vector.load %arg7[%c0_21, %c0_22] : memref<2x5xf32, #tpu.memory_space<vmem>>, vector<2x5xf32>
      tpu.vector_store %arg7[%c0_21, %c0_22], %22 {strides = array<i32>} : memref<2x5xf32, #tpu.memory_space<vmem>>, vector<2x5xf32>,
    } else {
    }
    return
  }
  func.func @transform_0(%arg0: i32, %arg1: i32) -> (i32, i32, i32) {
    %c0_i32 = arith.constant 0 : i32
    %c0_i32_0 = arith.constant 0 : i32
    return %arg0, %arg1, %c0_i32 : i32, i32, i32
  }
  func.func @transform_1(%arg0: i32, %arg1: i32) -> (i32, i32) {
    %c0_i32 = arith.constant 0 : i32
    %c0_i32_0 = arith.constant 0 : i32
    %c0_i32_1 = arith.constant 0 : i32
    return %c0_i32, %c0_i32_0 : i32, i32
  }
  func.func @transform_2(%arg0: i32, %arg1: i32) -> (i32, i32) {
    %c0_i32 = arith.constant 0 : i32
    %c0_i32_0 = arith.constant 0 : i32
    %c0_i32_1 = arith.constant 0 : i32
    return %c0_i32, %c0_i32_0 : i32, i32
  }
  func.func @transform_3(%arg0: i32, %arg1: i32) -> (i32, i32) {
    %c0_i32 = arith.constant 0 : i32
    %c0_i32_0 = arith.constant 0 : i32
    %c0_i32_1 = arith.constant 0 : i32
    return %c0_i32, %c0_i32_0 : i32, i32
  }
  func.func @transform_4(%arg0: i32, %arg1: i32) -> (i32, i32) {
    %c0_i32 = arith.constant 0 : i32
    %c0_i32_0 = arith.constant 0 : i32
    %c0_i32_1 = arith.constant 0 : i32
    return %c0_i32, %c0_i32_0 : i32, i32
  }
  func.func @transform_5(%arg0: i32, %arg1: i32) -> (i32, i32) {
    %c0_i32 = arith.constant 0 : i32
    %c0_i32_0 = arith.constant 0 : i32
    return %arg0, %c0_i32 : i32, i32
  }
}

</mosaic_0001>

<bundles_post_ra>
// kernel: gru_submodel_forward.4
= control target key start
LH: loop header
LB: loop body
LE: loop exit
PB: predicated region body
PF: predicated region fallthrough
CT: control target
= control target key end

     0   :  { %8 = vsyncpa [#allocation3], 0  ;;  %s228_s0 = inlined_call_operand.hbm [shape: f32[16,8], index: 0, kind: input, shape index: {}]   ;;  %s229_s1 = inlined_call_operand.hbm [shape: f32[8,96], index: 1, kind: input, shape index: {}]   ;;  %s230_s2 = inlined_call_operand.hbm [shape: f32[1,96], index: 2, kind: input, shape index: {}]   ;;  %s231_s3 = inlined_call_operand.vmem [shape: f32[16,96], index: 3, kind: output, shape index: {}]  }
   0x1   :  { %9 = vsyncpa [#allocation5], 0  ;;  %s28_s14 = sshll.u32 %s229_s1, 4  ;;  %s188_s15 = smov [#allocation4]   ;;  %s29_s14 = int_to_ptr.hbm [resolvable:$true] %s28_s14 }
   0x2   :  { %s30_s16 = sshll.u32 %s188_s15, 4  ;;  %s14_s19 = sshll.u32 %s228_s0, 4  ;;  %s31_s16 = int_to_ptr.vmem [resolvable:$true] %s30_s16  ;;  %s15_s19 = int_to_ptr.hbm [resolvable:$true] %s14_s19 }
   0x3   :  { %33 = dma.hbm_to_vmem [thread:$0]  %s29_s14, 128, %s31_s16, [#allocation5]  }
   0x4   :  { %s189_s20 = smov [#allocation2]   ;;  %s190_s22 = smov 128  }
   0x5   :  { %s16_s21 = sshll.u32 %s189_s20, 4  ;;  %s191_s23 = smov 8   ;;  %s17_s21 = int_to_ptr.vmem [resolvable:$true] %s16_s21 }
   0x6   :  { %22 = dma.hbm_to_vmem [thread:$0]  %s15_s19, 256, %s17_s21, [#allocation3], %s190_s22, %s190_s22, %s191_s23  }
   0x7   :  { %s39_s1 = sshll.u32 %s230_s2, 4  ;;  %s192_s26 = smov [#allocation6]   ;;  %s40_s1 = int_to_ptr.hbm [resolvable:$true] %s39_s1 }
   0x8   :  { %s41_s27 = sshll.u32 %s192_s26, 4  ;;  %s42_s27 = int_to_ptr.vmem [resolvable:$true] %s41_s27 }
   0x9   :  { %44 = dma.hbm_to_vmem [thread:$0]  %s40_s1, 16, %s42_s27, [#allocation5]  }
   0xa   :  { %184 = dma.done.wait [#allocation3], 256  }
   0xb   :  { %185 = vsyncadd [#allocation3], 4294967040 }
   0xc   :  { %186 = dma.done.wait [#allocation5], 144  }
   0xd   :  { %187 = vsyncadd [#allocation5], 4294967152  ;;  %vm64_vm0 = vcmask 64512   ;;  %v59_v0 = vld [vmem:[#allocation4] sm:$0xff]  ;;  %v57_v1 = vld [vmem:[#allocation2] sm:$0xff]  ;;  %vm94_vm1 = vcmask 785408  }
   0xe   :  { %v58_v2 = vld [vmem:[#allocation2 + $0x8] sm:$0xff]  ;;  %86 = vmatpush.msra.mxu0 %v59_v0  ;;  %105 = vmatpush.msra.mxu1 %v59_v0  ;;  %v111_v3 = vld [vmem:[#allocation6] ss:$0 sm:$0xff] }
   0xf   :  { %103 = vmatmul.msk.f32.vlgmr.msra.gmra.mxu0 %vm64_vm0, %v57_v1  ;;  %104 = vmatmul.msk.f32.vlgmr.msra.gmra.mxu1 %vm64_vm0, %v58_v2 }
  0x8c   :  { %v88_v4 = vpop.f32.mrf.mxu0  ;;  %v91_v5 = vpop.f32.mrf.mxu1 }
  0x8d   :  { %v89_v6 = vadd.f32 %v111_v3, %v88_v4  ;;  %v92_v7 = vadd.f32 %v111_v3, %v91_v5 }
  0x8f   :  { %95 = vst.msk [vmem:[%s231_s3] sm:$0xff] %vm94_vm1, %v89_v6 }
  0x90   :  { %96 = vst.msk [vmem:[%s231_s3 + $0x8] sm:$0xff] %vm94_vm1, %v92_v7 }
  0x91   :  { %101 = vsyncpa [#allocation3], 1 }
  0x92   :  { %102 = vsyncpa [#allocation5], 1 }

// kernel: gru_submodel_forward.6
= control target key start
LH: loop header
LB: loop body
LE: loop exit
PB: predicated region body
PF: predicated region fallthrough
CT: control target
= control target key end

     0   :  { %8 = vsyncpa [#allocation3], 0  ;;  %s198_s0 = inlined_call_operand.vmem [shape: f32[16,32], index: 0, kind: input, shape index: {}]   ;;  %s199_s1 = inlined_call_operand.hbm [shape: f32[32,96], index: 1, kind: input, shape index: {}]   ;;  %s200_s2 = inlined_call_operand.hbm [shape: f32[1,96], index: 2, kind: input, shape index: {}]   ;;  %s201_s3 = inlined_call_operand.vmem [shape: f32[16,96], index: 3, kind: output, shape index: {}]  }
   0x1   :  { %s16_s14 = sshll.u32 %s199_s1, 4  ;;  %s17_s14 = int_to_ptr.hbm [resolvable:$true] %s16_s14 }
   0x2   :  { %9 = vsyncpa [#allocation5], 0  ;;  %s156_s15 = smov [#allocation2]   ;;  %s30_s19 = sshll.u32 %s200_s2, 4  ;;  %s31_s19 = int_to_ptr.hbm [resolvable:$true] %s30_s19 }
   0x3   :  { %s18_s16 = sshll.u32 %s156_s15, 4  ;;  %s157_s20 = smov 128   ;;  %s19_s16 = int_to_ptr.vmem [resolvable:$true] %s18_s16 }
   0x4   :  { %s158_s21 = smov 8   ;;  %s159_s22 = smov [#allocation4]  }
   0x5   :  { %24 = dma.hbm_to_vmem [thread:$0]  %s17_s14, 512, %s19_s16, [#allocation3], %s157_s20, %s157_s20, %s158_s21  }
   0x6   :  { %s32_s23 = sshll.u32 %s159_s22, 4  ;;  %s33_s23 = int_to_ptr.vmem [resolvable:$true] %s32_s23 }
   0x7   :  { %35 = dma.hbm_to_vmem [thread:$0]  %s31_s19, 16, %s33_s23, [#allocation5]  }
   0x8   :  { %152 = dma.done.wait [#allocation3], 512  }
   0x9   :  { %153 = vsyncadd [#allocation3], 4294966784 }
   0xa   :  { %154 = dma.done.wait [#allocation5], 16  }
   0xb   :  { %155 = vsyncadd [#allocation5], 4294967280  ;;  %v49_v0 = vld [vmem:[#allocation2 + $0x18] sm:$0xff]  ;;  %v48_v1 = vld [vmem:[#allocation2 + $0x10] sm:$0xff]  ;;  %vm54_vm0 = vcmask 261120   ;;  %vm84_vm1 = vcmask 785408  }
   0xc   :  { %73 = vmatpush.msra.mxu0 %v49_v0  ;;  %95 = vmatpush.msra.mxu1 %v49_v0  ;;  %v47_v2 = vld [vmem:[#allocation2 + $0x8] sm:$0xff]  ;;  %v46_v3 = vld [vmem:[#allocation2] sm:$0xff] }
   0xd   :  { %v44_v4 = vld [vmem:[%s198_s0] sm:$0xff]  ;;  %v45_v5 = vld [vmem:[%s198_s0 + $0x8] sm:$0xff] }
   0xe   :  { %74 = vmatpush.msra.mxu0 %v48_v1  ;;  %96 = vmatpush.msra.mxu1 %v48_v1  ;;  %v103_v6 = vld [vmem:[#allocation4] ss:$0 sm:$0xff] }
  0x10   :  { %75 = vmatpush.msra.mxu0 %v47_v2  ;;  %97 = vmatpush.msra.mxu1 %v47_v2 }
  0x12   :  { %76 = vmatpush.msra.mxu0 %v46_v3  ;;  %98 = vmatpush.msra.mxu1 %v46_v3 }
  0x13   :  { %93 = vmatmul.msk.f32.vlgmr.msra.gmra.mxu0 %vm54_vm0, %v44_v4  ;;  %94 = vmatmul.msk.f32.vlgmr.msra.gmra.mxu1 %vm54_vm0, %v45_v5 }
  0x90   :  { %v78_v7 = vpop.f32.mrf.mxu0  ;;  %v81_v8 = vpop.f32.mrf.mxu1 }
  0x91   :  { %v79_v9 = vadd.f32 %v103_v6, %v78_v7  ;;  %v82_v10 = vadd.f32 %v103_v6, %v81_v8 }
  0x93   :  { %85 = vst.msk [vmem:[%s201_s3] sm:$0xff] %vm84_vm1, %v79_v9 }
  0x94   :  { %86 = vst.msk [vmem:[%s201_s3 + $0x8] sm:$0xff] %vm84_vm1, %v82_v10 }
  0x95   :  { %91 = vsyncpa [#allocation3], 1 }
  0x96   :  { %92 = vsyncpa [#allocation5], 1 }

// kernel: gru_submodel_forward.5
= control target key start
LH: loop header
LB: loop body
LE: loop exit
PB: predicated region body
PF: predicated region fallthrough
CT: control target
= control target key end

     0   :  { %8 = vsyncpa [#allocation4], 0  ;;  %s391_s0 = inlined_call_operand.vmem [shape: f32[2,8,96], index: 0, kind: input, shape index: {}]   ;;  %s392_s1 = inlined_call_operand.hbm [shape: f32[32,96], index: 1, kind: input, shape index: {}]   ;;  %s393_s2 = inlined_call_operand.hbm [shape: f32[1,32], index: 2, kind: input, shape index: {}]   ;;  %s394_s3 = inlined_call_operand.vmem [shape: f32[2,8,32], index: 3, kind: output, shape index: {}]  }
   0x1   :  { %s16_s14 = sshll.u32 %s392_s1, 4  ;;  %s17_s14 = int_to_ptr.hbm [resolvable:$true] %s16_s14 }
   0x2   :  { %9 = vsyncpa [#allocation6], 0  ;;  %s312_s15 = smov [#allocation3]   ;;  %s30_s19 = sshll.u32 %s393_s2, 4  ;;  %s31_s19 = int_to_ptr.hbm [resolvable:$true] %s30_s19 }
   0x3   :  { %s18_s16 = sshll.u32 %s312_s15, 4  ;;  %s313_s20 = smov 128   ;;  %s19_s16 = int_to_ptr.vmem [resolvable:$true] %s18_s16 }
   0x4   :  { %s314_s21 = smov 8   ;;  %s315_s22 = smov [#allocation5]  }
   0x5   :  { %24 = dma.hbm_to_vmem [thread:$0]  %s17_s14, 512, %s19_s16, [#allocation4], %s313_s20, %s313_s20, %s314_s21  }
   0x6   :  { %s32_s23 = sshll.u32 %s315_s22, 4  ;;  %s33_s23 = int_to_ptr.vmem [resolvable:$true] %s32_s23 }
   0x7   :  { %35 = dma.hbm_to_vmem [thread:$0]  %s31_s19, 16, %s33_s23, [#allocation6]  }
   0x8   :  { %304 = dma.done.wait [#allocation4], 512  }
   0x9   :  { %305 = vsyncadd [#allocation4], 4294966784 }
   0xa   :  { %306 = dma.done.wait [#allocation6], 16  }
   0xb   :  { %307 = vsyncadd [#allocation6], 4294967280  ;;  %vm48_vm0 = vcmask 254976   ;;  %v316_v0 = vmov 0.0   ;;  %v347_v1 = vld [vmem:[#allocation3] sm:$0xff]  ;;  %v349_v2 = vld [vmem:[#allocation3 + $0x8] sm:$0xff] }
   0xc   :  { %49 = vst.msk [vmem:[#allocation2] sm:$0x3] %vm48_vm0, %v316_v0  ;;  %v351_v3 = vld [vmem:[#allocation3 + $0x10] sm:$0xff]  ;;  %v353_v4 = vld [vmem:[#allocation3 + $0x18] sm:$0xff]  ;;  %v355_v5 = vld [vmem:[#allocation5] sm:$0x1] }
   0xd   :  { %s357_s1 = smov 0  }
   0xe LB: > { %85 = vmatpush.msra.mxu0 %v353_v4  ;;  %v138_v6 = vperm.slane %v355_v5, 0  ;;  %s317_s2 = smov 64   ;;  %vm69_vm1 = vcmask 261120   ;;  %s318_s24 = smov 32   ;;  %vm191_vm10 = vcmask 1041409   ;;  %vm205_vm11 = vcmask 253952   ;;  %s310_s1 = sphi %s357_s1, %s62_s1  }
   0xf   : > { %s65_s27 = scalar_lea.vmem %s391_s0, %s310_s1  ;;  %s319_s28 = smov 96  }
  0x10   : > { %86 = vmatpush.msra.mxu0 %v351_v3  ;;  %139 = vrot.lane.b32.xlu0 %v138_v6, %s317_s2  ;;  %v66_v13 = vld [vmem:[%s65_s27] sm:$0x1]  ;;  %v67_v15 = vld [vmem:[%s65_s27 + $0x8] sm:$0x1]  ;;  %s204_s4 = scalar_lea.vmem %s394_s3, %s310_s1  ;;  %s62_s1 = sadd.s32 1, %s310_s1  }
  0x11   : > { %p61_p0 = scmp.ge.s32.totalorder %s62_s1, 8 }
  0x12   : > { %87 = vmatpush.msra.mxu0 %v349_v2 }
  0x13   : > { %v367_v7 = vld [vmem:[#allocation2] sm:$0x3] }
  0x14   : > { %88 = vmatpush.msra.mxu0 %v347_v1  ;;  %v177_v12 = vrot.slane %v367_v7, 1 }
  0x15   : > { %221 = vmatmul.msk.f32.vlgmr.msra.gmra.mxu0 %vm69_vm1, %v367_v7 }
  0x82   : > { %v140_v8 = vpop.permute.xlu0 %139 }
  0x92   : > { %v90_v9 = vpop.f32.mrf.mxu0 }
  0x93   : > { %v142_v10 = vadd.f32 %v140_v8, %v90_v9  ;;  %v94_v14 = vrot.slane %v90_v9, 1  ;;  %v97_v16 = vadd.f32 %v90_v9, %v66_v13 }
  0x95   : > { %145 = vrot.lane.b32.xlu1 %v142_v10, %s317_s2  ;;  %v144_v11 = vrot.slane %v142_v10, 1  ;;  %v98_v17 = vadd.f32 %v94_v14, %v67_v15  ;;  %v222_v18 = vmul.f32 -1.442695, %v97_v16 }
  0x97   : > { %147 = vrot.lane.b32.xlu0 %v144_v11, %s317_s2  ;;  %v223_v19 = vmul.f32 -1.442695, %v98_v17  ;;  %240 = vpow2.f32 %v222_v18 }
  0x99   : > { %242 = vpow2.f32 %v223_v19 }
  0x9d   : > { %v241_v20 = vpop.eup %240 }
  0x9e   : > { %v105_v22 = vadd.f32 1.0, %v241_v20 }
  0x9f   : > { %180 = vrot.lane.b32.xlu0 %v177_v12, %s318_s24  ;;  %v243_v21 = vpop.eup %242 }
  0xa0   : > { %v106_v23 = vadd.f32 1.0, %v243_v21  ;;  %244 = vrcp.f32 %v105_v22  ;;  %v118_v33 = vand.u32 2147483648, %v105_v22  ;;  %vm112_vm3 = vweird.f32 %v105_v22 }
  0xa1   : > { %v116_v34 = vand.u32 2147483647, %v105_v22 }
  0xa2   : > { %246 = vrcp.f32 %v106_v23  ;;  %v133_v36 = vand.u32 2147483648, %v106_v23  ;;  %vm127_vm6 = vweird.f32 %v106_v23  ;;  %v131_v38 = vand.u32 2147483647, %v106_v23 }
  0xa3   : > { %v119_v39 = vor.u32 1.1754944e-38, %v118_v33  ;;  %vm117_vm8 = vcmp.eq.f32.partialorder %v116_v34, 8.507059e+37 }
  0xa4   : > { %v134_v43 = vor.u32 1.1754944e-38, %v133_v36  ;;  %vm132_vm9 = vcmp.eq.f32.partialorder %v131_v38, 8.507059e+37 }
  0xa6   : > { %v245_v24 = vpop.eup %244 }
  0xa7   : > { %v108_v26 = vmul.f32 %v245_v24, %v105_v22  ;;  %vm113_vm2 = vweird.f32 %v245_v24 }
  0xa8   : > { %v247_v25 = vpop.eup %246  ;;  %vm114_vm5 = vmor %vm112_vm3, %vm113_vm2 }
  0xa9   : > { %v123_v27 = vmul.f32 %v247_v25, %v106_v23  ;;  %v109_v28 = vsub.f32 1.0, %v108_v26  ;;  %vm128_vm4 = vweird.f32 %v247_v25 }
  0xaa   : > { %vm129_vm7 = vmor %vm127_vm6, %vm128_vm4 }
  0xab   : > { %v124_v29 = vsub.f32 1.0, %v123_v27  ;;  %v110_v30 = vmul.f32 %v245_v24, %v109_v28 }
  0xad   : > { %v125_v31 = vmul.f32 %v247_v25, %v124_v29  ;;  %v111_v32 = vadd.f32 %v245_v24, %v110_v30 }
  0xaf   : > { %v126_v35 = vadd.f32 %v247_v25, %v125_v31  ;;  %v115_v37 = vsel %vm114_vm5, %v245_v24, %v111_v32 }
  0xb0   : > { %v120_v42 = vsel %vm117_vm8, %v119_v39, %v115_v37 }
  0xb1   : > { %v130_v40 = vsel %vm129_vm7, %v247_v25, %v126_v35  ;;  %v165_v61 = vsub.f32 1.0, %v120_v42 }
  0xb2   : > { %v135_v46 = vsel %vm132_vm9, %v134_v43, %v130_v40 }
  0xb3   : > { %v166_v55 = vsub.f32 1.0, %v135_v46 }
 0x107   : > { %v146_v41 = vpop.permute.xlu1 %145 }
 0x108   : > { %v151_v44 = vmul.f32 %v146_v41, %v120_v42 }
 0x109   : > { %v148_v45 = vpop.permute.xlu0 %147 }
 0x10a   : > { %v152_v47 = vmul.f32 %v148_v45, %v135_v46  ;;  %155 = vrot.lane.b32.xlu2 %v151_v44, %s317_s2 }
 0x10c   : > { %157 = vrot.lane.b32.xlu1 %v152_v47, %s317_s2 }
 0x111   : > { %v181_v54 = vpop.permute.xlu0 %180 }
 0x112   : > { %v185_v57 = vmul.f32 %v181_v54, %v135_v46 }
 0x164   : > { %v156_v48 = vpop.permute.xlu2 %155 }
 0x165   : > { %v161_v49 = vadd.f32 %v156_v48, %v66_v13 }
 0x167   : > { %248 = vtanh.f32 %v161_v49 }
 0x16d   : > { %v249_v50 = vpop.eup %248 }
 0x16e   : > { %169 = vrot.lane.b32.xlu1 %v249_v50, %s319_s28 }
 0x17e   : > { %v158_v51 = vpop.permute.xlu1 %157 }
 0x17f   : > { %v162_v52 = vadd.f32 %v158_v51, %v67_v15 }
 0x181   : > { %250 = vtanh.f32 %v162_v52 }
 0x187   : > { %v251_v53 = vpop.eup %250 }
 0x188   : > { %171 = vrot.lane.b32.xlu2 %v251_v53, %s319_s28 }
 0x190   : > { %178 = vrot.lane.b32.xlu2 %v367_v7, %s318_s24 }
 0x1e0   : > { %v170_v60 = vpop.permute.xlu1 %169 }
 0x1e1   : > { %v175_v63 = vmul.f32 %v170_v60, %v165_v61 }
 0x1e2   : > { %v172_v56 = vpop.permute.xlu2 %171 }
 0x1e3   : > { %v176_v58 = vmul.f32 %v172_v56, %v166_v55 }
 0x1e5   : > { %v187_v59 = vadd.f32 %v185_v57, %v176_v58 }
 0x1e7   : > { %200 = vrot.lane.b32.xlu2 %v187_v59, %s319_s28  ;;  %v190_v6 = vrot.slane %v187_v59, 7 }
 0x1ea   : > { %v179_v62 = vpop.permute.xlu2 %178 }
 0x1eb   : > { %v184_v0 = vmul.f32 %v179_v62, %v120_v42 }
 0x1ed   : > { %v186_v8 = vadd.f32 %v184_v0, %v175_v63 }
 0x1ef   : > { %198 = vrot.lane.b32.xlu1 %v186_v8, %s319_s28  ;;  %v192_v9 = vsel %vm191_vm10, %v190_v6, %v186_v8 }
 0x1f0   : > { %193 = vrot.lane.b32.xlu0 %v192_v9, %s319_s28 }
 0x241   : > { %v201_v7 = vpop.permute.xlu2 %200 }
 0x242   : > { %207 = vst.msk [vmem:[%s204_s4 + $0x8] sm:$0x1] %vm205_vm11, %v201_v7 }
 0x25f   :  { %64 = sbr.rel (!%p61_p0) target bundleno = 14 (0xe), region = 53 }
 0x261   : > { %v199_v10 = vpop.permute.xlu1 %198 }
 0x262   : > { %206 = vst.msk [vmem:[%s204_s4] sm:$0x1] %vm205_vm11, %v199_v10  ;;  %v194_v11 = vpop.permute.xlu0 %193 }
 0x263   : > { %197 = vst.msk [vmem:[#allocation2] sm:$0x3] %vm48_vm0, %v194_v11 }
 0x264   :  { %212 = vsyncpa [#allocation4], 1 }
 0x265   :  { %213 = vsyncpa [#allocation6], 1 }

// kernel: gru_submodel_forward.7
= control target key start
LH: loop header
LB: loop body
LE: loop exit
PB: predicated region body
PF: predicated region fallthrough
CT: control target
= control target key end

     0   :  { %10 = vsyncpa [#allocation4], 0  ;;  %vm25_vm0 = vcmask 254976   ;;  %v299_v2 = vmov 0.0   ;;  %s360_s28 = smov 0   ;;  %s410_s0 = inlined_call_operand.vmem [shape: f32[2,8,96], index: 0, kind: input, shape index: {}]   ;;  %s411_s1 = inlined_call_operand.vmem [shape: f32[32,96], index: 1, kind: input, shape index: {}]   ;;  %s412_s2 = inlined_call_operand.vmem [shape: f32[1,32], index: 2, kind: input, shape index: {}]   ;;  %s413_s3 = inlined_call_operand.vmem [shape: f32[32,5], index: 3, kind: input, shape index: {}]   ;;  %s414_s4 = inlined_call_operand.vmem [shape: f32[1,5], index: 4, kind: input, shape index: {}]   ;;  %s415_s5 = inlined_call_operand.hbm [shape: f32[2,5], index: 5, kind: output, shape index: {}]  }
   0x1   :  { %v337_v0 = vld [vmem:[%s411_s1] sm:$0xff]  ;;  %v342_v1 = vld [vmem:[%s411_s1 + $0x8] sm:$0xff]  ;;  %26 = vst.msk [vmem:[#allocation2] sm:$0x3] %vm25_vm0, %v299_v2  ;;  %v348_v3 = vld [vmem:[%s411_s1 + $0x10] sm:$0xff] }
   0x2   :  { %v353_v4 = vld [vmem:[%s411_s1 + $0x18] sm:$0xff]  ;;  %v358_v5 = vld [vmem:[%s412_s2] sm:$0x1] }
   0x3 LB: > { %62 = vmatpush.msra.mxu0 %v353_v4  ;;  %v115_v6 = vperm.slane %v358_v5, 0  ;;  %s300_s1 = smov 64   ;;  %vm46_vm1 = vcmask 261120   ;;  %s301_s2 = smov 32   ;;  %vm168_vm10 = vcmask 1041409   ;;  %s297_s28 = sphi %s360_s28, %s39_s28  }
   0x4   : > { %s42_s6 = scalar_lea.vmem %s410_s0, %s297_s28  ;;  %s302_s7 = smov 96  }
   0x5   : > { %63 = vmatpush.msra.mxu0 %v348_v3  ;;  %116 = vrot.lane.b32.xlu0 %v115_v6, %s300_s1  ;;  %v43_v13 = vld [vmem:[%s42_s6] sm:$0x1]  ;;  %v44_v15 = vld [vmem:[%s42_s6 + $0x8] sm:$0x1]  ;;  %s39_s28 = sadd.s32 1, %s297_s28  }
   0x6   : > { %p38_p0 = scmp.ge.s32.totalorder %s39_s28, 8 }
   0x7   : > { %64 = vmatpush.msra.mxu0 %v342_v1  ;;  %s303_s17 = smov (%p38_p0), [#allocation3]   ;;  %s220_s21 = sshll.u32 (%p38_p0), %s415_s5, 4  ;;  %vm211_vm11 = vcmask (%p38_p0), 33792   ;;  %s221_s21 = int_to_ptr.hbm [resolvable:$true] %s220_s21 }
   0x8   : > { %v370_v7 = vld [vmem:[#allocation2] sm:$0x3]  ;;  %s218_s18 = sshll.u32 (%p38_p0), %s303_s17, 4  ;;  %s219_s18 = int_to_ptr.vmem [resolvable:$true] %s218_s18 }
   0x9   : > { %65 = vmatpush.msra.mxu0 %v337_v0  ;;  %v154_v12 = vrot.slane %v370_v7, 1  ;;  %v264_v0 = vld [vmem:[%s414_s4] ss:$0 sm:$0xff] (%p38_p0) }
   0xa   : > { %235 = vmatmul.msk.f32.vlgmr.msra.gmra.mxu0 %vm46_vm1, %v370_v7 }
  0x77   : > { %v117_v8 = vpop.permute.xlu0 %116 }
  0x87   : > { %v67_v9 = vpop.f32.mrf.mxu0 }
  0x88   : > { %v119_v10 = vadd.f32 %v117_v8, %v67_v9  ;;  %v71_v14 = vrot.slane %v67_v9, 1  ;;  %v74_v16 = vadd.f32 %v67_v9, %v43_v13 }
  0x8a   : > { %122 = vrot.lane.b32.xlu1 %v119_v10, %s300_s1  ;;  %v121_v11 = vrot.slane %v119_v10, 1  ;;  %v75_v17 = vadd.f32 %v71_v14, %v44_v15  ;;  %v236_v18 = vmul.f32 -1.442695, %v74_v16 }
  0x8c   : > { %124 = vrot.lane.b32.xlu0 %v121_v11, %s300_s1  ;;  %v237_v19 = vmul.f32 -1.442695, %v75_v17  ;;  %252 = vpow2.f32 %v236_v18  ;;  %v181_v11 = vld [vmem:[%s413_s3 + $0x10] sm:$0xff] (%p38_p0) }
  0x8e   : > { %254 = vpow2.f32 %v237_v19 }
  0x92   : > { %v253_v20 = vpop.eup %252 }
  0x93   : > { %v82_v22 = vadd.f32 1.0, %v253_v20 }
  0x94   : > { %157 = vrot.lane.b32.xlu0 %v154_v12, %s301_s2  ;;  %v255_v21 = vpop.eup %254  ;;  %v180_v12 = vld [vmem:[%s413_s3 + $0x8] sm:$0xff] (%p38_p0) }
  0x95   : > { %v83_v23 = vadd.f32 1.0, %v255_v21  ;;  %256 = vrcp.f32 %v82_v22  ;;  %v95_v33 = vand.u32 2147483648, %v82_v22  ;;  %vm89_vm3 = vweird.f32 %v82_v22 }
  0x96   : > { %v93_v34 = vand.u32 2147483647, %v82_v22 }
  0x97   : > { %258 = vrcp.f32 %v83_v23  ;;  %v110_v36 = vand.u32 2147483648, %v83_v23  ;;  %vm104_vm6 = vweird.f32 %v83_v23  ;;  %v108_v38 = vand.u32 2147483647, %v83_v23 }
  0x98   : > { %v96_v39 = vor.u32 1.1754944e-38, %v95_v33  ;;  %vm94_vm8 = vcmp.eq.f32.partialorder %v93_v34, 8.507059e+37 }
  0x99   : > { %v111_v43 = vor.u32 1.1754944e-38, %v110_v36  ;;  %vm109_vm9 = vcmp.eq.f32.partialorder %v108_v38, 8.507059e+37 }
  0x9b   : > { %v257_v24 = vpop.eup %256 }
  0x9c   : > { %v85_v26 = vmul.f32 %v257_v24, %v82_v22  ;;  %vm90_vm2 = vweird.f32 %v257_v24 }
  0x9d   : > { %v259_v25 = vpop.eup %258  ;;  %vm91_vm5 = vmor %vm89_vm3, %vm90_vm2 }
  0x9e   : > { %v100_v27 = vmul.f32 %v259_v25, %v83_v23  ;;  %v86_v28 = vsub.f32 1.0, %v85_v26  ;;  %vm105_vm4 = vweird.f32 %v259_v25 }
  0x9f   : > { %vm106_vm7 = vmor %vm104_vm6, %vm105_vm4 }
  0xa0   : > { %v101_v29 = vsub.f32 1.0, %v100_v27  ;;  %v87_v30 = vmul.f32 %v257_v24, %v86_v28 }
  0xa2   : > { %v102_v31 = vmul.f32 %v259_v25, %v101_v29  ;;  %v88_v32 = vadd.f32 %v257_v24, %v87_v30 }
  0xa4   : > { %v103_v35 = vadd.f32 %v259_v25, %v102_v31  ;;  %v92_v37 = vsel %vm91_vm5, %v257_v24, %v88_v32 }
  0xa5   : > { %v97_v42 = vsel %vm94_vm8, %v96_v39, %v92_v37 }
  0xa6   : > { %v107_v40 = vsel %vm106_vm7, %v259_v25, %v103_v35  ;;  %v142_v60 = vsub.f32 1.0, %v97_v42 }
  0xa7   : > { %v112_v46 = vsel %vm109_vm9, %v111_v43, %v107_v40 }
  0xa8   : > { %v143_v55 = vsub.f32 1.0, %v112_v46 }
  0xfc   : > { %v123_v41 = vpop.permute.xlu1 %122 }
  0xfd   : > { %v128_v44 = vmul.f32 %v123_v41, %v97_v42 }
  0xfe   : > { %v125_v45 = vpop.permute.xlu0 %124 }
  0xff   : > { %v129_v47 = vmul.f32 %v125_v45, %v112_v46  ;;  %132 = vrot.lane.b32.xlu2 %v128_v44, %s300_s1 }
 0x101   : > { %134 = vrot.lane.b32.xlu1 %v129_v47, %s300_s1 }
 0x106   : > { %v158_v56 = vpop.permute.xlu0 %157 }
 0x107   : > { %v162_v58 = vmul.f32 %v158_v56, %v112_v46 }
 0x159   : > { %v133_v48 = vpop.permute.xlu2 %132 }
 0x15a   : > { %v138_v49 = vadd.f32 %v133_v48, %v43_v13  ;;  %v179_v13 = vld [vmem:[%s413_s3] sm:$0xff] (%p38_p0) }
 0x15c   : > { %260 = vtanh.f32 %v138_v49 }
 0x162   : > { %v261_v50 = vpop.eup %260 }
 0x163   : > { %146 = vrot.lane.b32.xlu1 %v261_v50, %s302_s7 }
 0x173   : > { %v135_v51 = vpop.permute.xlu1 %134 }
 0x174   : > { %v139_v52 = vadd.f32 %v135_v51, %v44_v15 }
 0x176   : > { %262 = vtanh.f32 %v139_v52 }
 0x17c   : > { %v263_v53 = vpop.eup %262 }
 0x17d   : > { %148 = vrot.lane.b32.xlu2 %v263_v53, %s302_s7 }
 0x185   : > { %155 = vrot.lane.b32.xlu2 %v370_v7, %s301_s2  ;;  %v182_v7 = vld [vmem:[%s413_s3 + $0x18] sm:$0xff] (%p38_p0) }
 0x186   :  { %203 = vmatpush.msra.mxu0 (%p38_p0), %v182_v7 }
 0x188   :  { %204 = vmatpush.msra.mxu0 (%p38_p0), %v181_v11 }
 0x18a   :  { %205 = vmatpush.msra.mxu0 (%p38_p0), %v180_v12 }
 0x18c   :  { %206 = vmatpush.msra.mxu0 (%p38_p0), %v179_v13 }
 0x1d5   : > { %v147_v59 = vpop.permute.xlu1 %146 }
 0x1d6   : > { %v152_v63 = vmul.f32 %v147_v59, %v142_v60 }
 0x1d7   : > { %v149_v54 = vpop.permute.xlu2 %148 }
 0x1d8   : > { %v153_v57 = vmul.f32 %v149_v54, %v143_v55 }
 0x1da   : > { %v164_v61 = vadd.f32 %v162_v58, %v153_v57 }
 0x1dc   : > { %v167_v6 = vrot.slane %v164_v61, 7 }
 0x1df   : > { %v156_v62 = vpop.permute.xlu2 %155 }
 0x1e0   : > { %v161_v2 = vmul.f32 %v156_v62, %v97_v42 }
 0x1e2   : > { %v163_v8 = vadd.f32 %v161_v2, %v152_v63 }
 0x1e4   : > { %v169_v9 = vsel %vm168_vm10, %v167_v6, %v163_v8 }
 0x1e5   : > { %170 = vrot.lane.b32.xlu0 %v169_v9, %s302_s7 }
 0x254   :  { %41 = sbr.rel (!%p38_p0) target bundleno = 3 (0x3), region = 56 }
 0x257   : > { %v171_v10 = vpop.permute.xlu0 %170 }
 0x258   : > { %174 = vst.msk [vmem:[#allocation2] sm:$0x3] %vm25_vm0, %v171_v10 }
 0x25f   :  { %v178_v14 = vld [vmem:[#allocation2] sm:$0x3] }
 0x260   :  { %238 = vmatmul.msk.f32.vlgmr.msra.gmra.mxu0 %vm46_vm1, %v178_v14 }
 0x2dd   :  { %v208_v1 = vpop.f32.mrf.mxu0 }
 0x2de   :  { %v209_v3 = vadd.f32 %v264_v0, %v208_v1 }
 0x2e0   :  { %212 = vst.msk [vmem:[#allocation3] sm:$0x3] %vm211_vm11, %v209_v3 }
 0x2e1   :  { %223 = dma.vmem_to_hbm [thread:$0]  %s219_s18, 32, %s221_s21, [#allocation4]  }
 0x2e2   :  { %293 = dma.done.wait [#allocation4], 32  }
 0x2e3   :  { %294 = vsyncadd [#allocation4], 4294967264 }
 0x2e4   :  { %228 = vsyncpa [#allocation4], 1 }

</bundles_post_ra>
